<compile_context>
chip_gen: v7x
topology: tpu7x:2x2x1
jax: 0.10.0
libtpu: 0.0.40
codegen_flags: <defaults>
</compile_context>

<pallas_src>
import functools

import jax
import jax.numpy as jnp
import numpy as np
from jax.experimental import pallas as pl
from jax.experimental.pallas import tpu as pltpu


# Rows per block: single block if B fits, else 512-row tiles (multiple of 8).
_MAX_SINGLE_BLOCK_ROWS = 1024
_TILE_B = 512


def _pick_tile(batch):
    if batch <= _MAX_SINGLE_BLOCK_ROWS:
        return batch, 1
    return _TILE_B, -(-batch // _TILE_B)


def _log_sum_exp(logits):
    m = jnp.max(logits, axis=-1, keepdims=True)
    return jnp.log(jnp.sum(jnp.exp(logits - m), axis=-1, keepdims=True)) + m


def _row_mask(shape, tile_b, actual_b, tile_idx):
    row = jax.lax.broadcasted_iota(jnp.int32, shape, 0) + tile_idx * tile_b
    return row < actual_b


# ----------------------------------------------------------------------------
# Per-row loss math (shared between the per-mode and fused kernels)
# ----------------------------------------------------------------------------
def _first_time_ce(times, target, alpha_fs, lam, beta, step, test):
    """Per-row contribution [tile_b, 1] of the first_time loss (un-normalized)."""
    logits = alpha_fs * (jnp.min(times, axis=-1, keepdims=True) - times)
    lse = _log_sum_exp(logits)
    # one-hot identity: sum(-t * log_softmax) == lse - sum(t * logits)
    ce = lse - jnp.sum(target * logits, axis=-1, keepdims=True)
    if not test:
        # one-hot identity: gather(times, argmax(target)) == sum(target * times)
        labeled_time = jnp.sum(target * times, axis=-1, keepdims=True)
        labeled_time = jnp.where(labeled_time <= step, 0.0, labeled_time)
        ce = ce + lam * (jnp.exp(beta * labeled_time) - 1.0)
    return ce


def _firing_rate_ce(rate, target, alpha_fr):
    logits = alpha_fr * rate
    lse = _log_sum_exp(logits)
    return lse - jnp.sum(target * logits, axis=-1, keepdims=True)


# ----------------------------------------------------------------------------
# Kernels (grid over batch tiles; SMEM output doubles as the accumulator)
# ----------------------------------------------------------------------------
def _first_time_kernel(alpha_fs, lam, beta, step, test, actual_b, tile_b,
                       needs_mask, times_ref, target_ref, out_ref):
    i = pl.program_id(0)

    @pl.when(i == 0)
    def _():
        out_ref[0, 0] = 0.0

    times = times_ref[...].astype(jnp.float32)
    target = target_ref[...].astype(jnp.float32)
    ce = _first_time_ce(times, target, alpha_fs, lam, beta, step, test)
    if needs_mask:
        ce = jnp.where(_row_mask(ce.shape, tile_b, actual_b, i), ce, 0.0)
    out_ref[0, 0] += jnp.sum(ce)

    @pl.when(i == pl.num_programs(0) - 1)
    def _():
        out_ref[0, 0] = out_ref[0, 0] / actual_b


def _firing_rate_kernel(alpha_fr, actual_b, tile_b, needs_mask,
                        rate_ref, target_ref, out_ref):
    i = pl.program_id(0)

    @pl.when(i == 0)
    def _():
        out_ref[0, 0] = 0.0

    rate = rate_ref[...].astype(jnp.float32)
    target = target_ref[...].astype(jnp.float32)
    ce = _firing_rate_ce(rate, target, alpha_fr)
    if needs_mask:
        ce = jnp.where(_row_mask(ce.shape, tile_b, actual_b, i), ce, 0.0)
    out_ref[0, 0] += jnp.sum(ce)

    @pl.when(i == pl.num_programs(0) - 1)
    def _():
        out_ref[0, 0] = out_ref[0, 0] / actual_b


def _fused_kernel(alpha_fs, alpha_fr, lam, beta, step, test, actual_b, tile_b,
                  needs_mask, times_ref, rate_ref, target_ref, out_ref):
    """Both losses in one launch; shares the loaded target tile."""
    i = pl.program_id(0)

    @pl.when(i == 0)
    def _():
        out_ref[0, 0] = 0.0
        out_ref[0, 1] = 0.0

    times = times_ref[...].astype(jnp.float32)
    rate = rate_ref[...].astype(jnp.float32)
    target = target_ref[...].astype(jnp.float32)

    ce_ft = _first_time_ce(times, target, alpha_fs, lam, beta, step, test)
    ce_fr = _firing_rate_ce(rate, target, alpha_fr)
    if needs_mask:
        mask = _row_mask(ce_ft.shape, tile_b, actual_b, i)
        ce_ft = jnp.where(mask, ce_ft, 0.0)
        ce_fr = jnp.where(mask, ce_fr, 0.0)

    out_ref[0, 0] += jnp.sum(ce_ft)
    out_ref[0, 1] += jnp.sum(ce_fr)

    @pl.when(i == pl.num_programs(0) - 1)
    def _():
        out_ref[0, 0] = out_ref[0, 0] / actual_b
        out_ref[0, 1] = out_ref[0, 1] / actual_b


# ----------------------------------------------------------------------------
# pallas_call builders (traced inside jit -> compiled once per shape)
# ----------------------------------------------------------------------------
def _run_reduction(kernel, arrays, n_cols, num_tiles, tile_b, n_out):
    in_specs = [pl.BlockSpec((tile_b, n_cols), lambda i: (i, 0))
                for _ in arrays]
    return pl.pallas_call(
        kernel,
        out_shape=jax.ShapeDtypeStruct((1, n_out), jnp.float32),
        grid=(num_tiles,),
        in_specs=in_specs,
        out_specs=pl.BlockSpec(memory_space=pltpu.MemorySpace.SMEM),
        compiler_params=pltpu.CompilerParams(
            dimension_semantics=("arbitrary",)),
    )(*arrays)


def _first_time_loss(times, target, *, alpha_fs, lam, beta, step, test):
    B, C = times.shape
    tile_b, num_tiles = _pick_tile(B)
    needs_mask = (tile_b * num_tiles != B)
    kernel = functools.partial(_first_time_kernel, alpha_fs, lam, beta, step,
                               test, B, tile_b, needs_mask)
    out = _run_reduction(kernel, (times, target), C, num_tiles, tile_b, 1)
    return out[0, 0]


def _firing_rate_loss(rate, target, *, alpha_fr):
    B, C = rate.shape
    tile_b, num_tiles = _pick_tile(B)
    needs_mask = (tile_b * num_tiles != B)
    kernel = functools.partial(_firing_rate_kernel, alpha_fr, B, tile_b,
                               needs_mask)
    out = _run_reduction(kernel, (rate, target), C, num_tiles, tile_b, 1)
    return out[0, 0]


def _fused_loss(times, rate, target, *, alpha_fs, alpha_fr, lam, beta, step,
                test):
    B, C = times.shape
    tile_b, num_tiles = _pick_tile(B)
    needs_mask = (tile_b * num_tiles != B)
    kernel = functools.partial(_fused_kernel, alpha_fs, alpha_fr, lam, beta,
                               step, test, B, tile_b, needs_mask)
    out = _run_reduction(kernel, (times, rate, target), C, num_tiles,
                         tile_b, 2)
    return out[0, 0], out[0, 1]


# ----------------------------------------------------------------------------
# Module wrapper (mirrors the PyTorch LossFn interface)
# ----------------------------------------------------------------------------
class LossFn:
    def __init__(self, loss_params, num_classes, step, mode='test'):
        self.num_classes = num_classes
        self.step = float(step)
        self.loss_mode = loss_params['loss_mode']
        self.test = False if mode == 'train' else True
        self.alpha_fs = float(loss_params['FS']['alpha'])
        self.alpha_fr = float(loss_params['FR']['alpha'])
        if mode == 'train':
            self.lambda_treg = float(loss_params['treg']['lambda'])
            self.beta_treg = float(loss_params['treg']['beta'])
        else:
            self.lambda_treg = 0.0
            self.beta_treg = 0.0

        # Build the jitted loss callables ONCE; jit's cache (keyed on these
        # stable callables + input shapes) avoids re-lowering per forward().
        self._ft_fn = jax.jit(functools.partial(
            _first_time_loss, alpha_fs=self.alpha_fs, lam=self.lambda_treg,
            beta=self.beta_treg, step=self.step, test=self.test))
        self._fr_fn = jax.jit(functools.partial(
            _firing_rate_loss, alpha_fr=self.alpha_fr))
        self._both_fn = jax.jit(functools.partial(
            _fused_loss, alpha_fs=self.alpha_fs, alpha_fr=self.alpha_fr,
            lam=self.lambda_treg, beta=self.beta_treg, step=self.step,
            test=self.test))

    def _unpack(self, outputs):
        if isinstance(outputs, (list, tuple)):
            assert len(outputs) == 2
            self.output_times, self.firing_rate = outputs
        else:
            self.firing_rate = outputs
            self.output_times = None

    def forward(self, outputs, target, loss_mode=None):
        """`target` is a one-hot label of shape [B, num_classes]."""
        if loss_mode is None:
            loss_mode = self.loss_mode
        self._unpack(outputs)

        if loss_mode == 'first_time':
            return self._ft_fn(self.output_times, target)
        elif loss_mode == 'firing_rate':
            return self._fr_fn(self.firing_rate, target)
        raise AssertionError(
            "loss_mode should be 'first_time' or 'firing_rate'!")

    def forward_both(self, outputs, target):
        """Fused: one pallas_call returning (first_time_loss, firing_rate_loss)."""
        self._unpack(outputs)
        assert self.output_times is not None
        return self._both_fn(self.output_times, self.firing_rate, target)

    __call__ = forward


# ----------------------------------------------------------------------------
# Pure-JAX reference (PyTorch math, for correctness check)
# ----------------------------------------------------------------------------
def _ref_first_time(times, target, alpha_fs, lam, beta, step, test):
    pred = -times + jnp.min(times, axis=-1, keepdims=True)
    p = jnp.exp(alpha_fs * pred)
    loss = jnp.mean(jnp.sum(-target * jnp.log(p / jnp.sum(p, -1, keepdims=True)),
                            -1, keepdims=True))
    if not test:
        idx = jnp.argmax(target, axis=1, keepdims=True)
        lt = jnp.take_along_axis(times, idx, axis=1)
        lt = jnp.where(lt <= step, 0.0, lt)
        loss = loss + lam * jnp.mean(jnp.exp(beta * lt) - 1.0)
    return loss


def _ref_firing_rate(rate, target, alpha_fr):
    p = jnp.exp(alpha_fr * rate)
    return jnp.mean(jnp.sum(-target * jnp.log(p / jnp.sum(p, -1, keepdims=True)),
                            -1, keepdims=True))


# ----------------------------------------------------------------------------
if __name__ == "__main__":
    key = jax.random.PRNGKey(0)
    k1, k2, k3 = jax.random.split(key, 3)

    B, C = 8, 16   # batch, num_classes
    output_times = jax.random.uniform(k1, (B, C), jnp.float32, 0.0, 10.0)
    firing_rate = jax.random.uniform(k2, (B, C), jnp.float32, 0.0, 1.0)
    labels = jax.random.randint(k3, (B,), 0, C)
    target = jax.nn.one_hot(labels, C, dtype=jnp.float32)

    loss_params = {
        'loss_mode': 'first_time',
        'FS': {'alpha': 1.0},
        'FR': {'alpha': 2.0},
        'treg': {'lambda': 0.01, 'beta': 0.1},
    }
    loss_fn = LossFn(loss_params, num_classes=C, step=1, mode='train')

    # Fused path: one kernel launch returning both losses.
    fused_ft, fused_fr = loss_fn.forward_both((output_times, firing_rate), target)
    # Per-mode path (cached jitted pallas_call, reused across calls).
    loss_ft = loss_fn((output_times, firing_rate), target)
    loss_fr = loss_fn((output_times, firing_rate), target, loss_mode='firing_rate')
    # Second call hits the jit cache (no re-lowering).
    loss_ft2 = loss_fn((output_times, firing_rate), target)
    jax.block_until_ready((fused_ft, fused_fr, loss_ft, loss_fr, loss_ft2))

    # Verify against the pure-JAX reference of the PyTorch math.
    ref_ft = _ref_first_time(output_times, target, 1.0, 0.01, 0.1, 1.0, False)
    ref_fr = _ref_firing_rate(firing_rate, target, 2.0)
    for got, ref in [(fused_ft, ref_ft), (fused_fr, ref_fr),
                     (loss_ft, ref_ft), (loss_fr, ref_fr), (loss_ft2, ref_ft)]:
        np.testing.assert_allclose(np.asarray(got), np.asarray(ref),
                                   rtol=1e-5, atol=1e-5)

    print("KERNEL_OK")
</pallas_src>

<mosaic_0001>
module attributes {stable_mosaic.version = 11 : i64} {
  func.func @_fused_kernel(%arg0: i32, %arg1: memref<8x16xf32, #tpu.memory_space<vmem>>, %arg2: memref<8x16xf32, #tpu.memory_space<vmem>>, %arg3: memref<8x16xf32, #tpu.memory_space<vmem>>, %arg4: memref<1x2xf32, #tpu.memory_space<smem>>) attributes {dimension_semantics = [#tpu.dimension_semantics<arbitrary>], iteration_bounds = array<i64: 1>, scalar_prefetch = 0 : i64, scratch_operands = 0 : i64, tpu.core_type = #tpu.core_type<tc>, window_params = [{transform_indices = @transform_0, window_bounds = array<i64: 8, 16>}, {transform_indices = @transform_1, window_bounds = array<i64: 8, 16>}, {transform_indices = @transform_2, window_bounds = array<i64: 8, 16>}, {transform_indices = @transform_3, window_bounds = array<i64: 1, 2>}]} {
    %c0_i32 = arith.constant 0 : i32
    %0 = arith.cmpi eq, %arg0, %c0_i32 : i32
    %1 = arith.extui %0 : i1 to i32
    %c0_i32_0 = arith.constant 0 : i32
    %2 = arith.cmpi ne, %1, %c0_i32_0 : i32
    scf.if %2 {
      %cst_31 = arith.constant 0.000000e+00 : f32
      %c0_32 = arith.constant 0 : index
      %c0_33 = arith.constant 0 : index
      %72 = memref.load %arg4[%c0_32, %c0_33] : memref<1x2xf32, #tpu.memory_space<smem>>
      memref.store %cst_31, %arg4[%c0_32, %c0_33] : memref<1x2xf32, #tpu.memory_space<smem>>
      %cst_34 = arith.constant 0.000000e+00 : f32
      %c0_35 = arith.constant 0 : index
      %c1_36 = arith.constant 1 : index
      %73 = memref.load %arg4[%c0_35, %c1_36] : memref<1x2xf32, #tpu.memory_space<smem>>
      memref.store %cst_34, %arg4[%c0_35, %c1_36] : memref<1x2xf32, #tpu.memory_space<smem>>
    } else {
    }
    %c0 = arith.constant 0 : index
    %c0_1 = arith.constant 0 : index
    %3 = vector.load %arg1[%c0, %c0_1] : memref<8x16xf32, #tpu.memory_space<vmem>>, vector<8x16xf32>
    %c0_2 = arith.constant 0 : index
    %c0_3 = arith.constant 0 : index
    %4 = vector.load %arg2[%c0_2, %c0_3] : memref<8x16xf32, #tpu.memory_space<vmem>>, vector<8x16xf32>
    %c0_4 = arith.constant 0 : index
    %c0_5 = arith.constant 0 : index
    %5 = vector.load %arg3[%c0_4, %c0_5] : memref<8x16xf32, #tpu.memory_space<vmem>>, vector<8x16xf32>
    %cst = arith.constant dense<0x7F800000> : vector<8xf32>
    %6 = vector.multi_reduction <minimumf>, %3, %cst [1] : vector<8x16xf32> to vector<8xf32>
    %7 = vector.shape_cast %6 : vector<8xf32> to vector<8x1xf32>
    %8 = vector.broadcast %7 : vector<8x1xf32> to vector<8x16xf32>
    %9 = arith.subf %8, %3 : vector<8x16xf32>
    %cst_6 = arith.constant 1.000000e+00 : f32
    %10 = vector.broadcast %cst_6 : f32 to vector<8x16xf32>
    %11 = arith.mulf %10, %9 : vector<8x16xf32>
    %cst_7 = arith.constant dense<0xFF800000> : vector<8xf32>
    %12 = vector.multi_reduction <maximumf>, %11, %cst_7 [1] : vector<8x16xf32> to vector<8xf32>
    %13 = vector.shape_cast %12 : vector<8xf32> to vector<8x1xf32>
    %14 = vector.broadcast %13 : vector<8x1xf32> to vector<8x16xf32>
    %15 = arith.subf %11, %14 : vector<8x16xf32>
    %16 = math.exp %15 : vector<8x16xf32>
    %cst_8 = arith.constant dense<0.000000e+00> : vector<8xf32>
    %17 = vector.multi_reduction <add>, %16, %cst_8 [1] : vector<8x16xf32> to vector<8xf32>
    %18 = vector.shape_cast %17 : vector<8xf32> to vector<8x1xf32>
    %19 = math.log %18 : vector<8x1xf32>
    %20 = arith.addf %19, %13 : vector<8x1xf32>
    %21 = arith.mulf %5, %11 : vector<8x16xf32>
    %cst_9 = arith.constant dense<0.000000e+00> : vector<8xf32>
    %22 = vector.multi_reduction <add>, %21, %cst_9 [1] : vector<8x16xf32> to vector<8xf32>
    %23 = vector.shape_cast %22 : vector<8xf32> to vector<8x1xf32>
    %24 = arith.subf %20, %23 : vector<8x1xf32>
    %25 = arith.mulf %5, %3 : vector<8x16xf32>
    %cst_10 = arith.constant dense<0.000000e+00> : vector<8xf32>
    %26 = vector.multi_reduction <add>, %25, %cst_10 [1] : vector<8x16xf32> to vector<8xf32>
    %27 = vector.shape_cast %26 : vector<8xf32> to vector<8x1xf32>
    %cst_11 = arith.constant 1.000000e+00 : f32
    %28 = vector.broadcast %cst_11 : f32 to vector<8x1xf32>
    %29 = arith.cmpf ole, %27, %28 : vector<8x1xf32>
    %cst_12 = arith.constant 0.000000e+00 : f32
    %30 = vector.broadcast %cst_12 : f32 to vector<8x1xf32>
    %31 = arith.select %29, %30, %27 : vector<8x1xi1>, vector<8x1xf32>
    %cst_13 = arith.constant 1.000000e-01 : f32
    %32 = vector.broadcast %cst_13 : f32 to vector<8x1xf32>
    %33 = arith.mulf %32, %31 : vector<8x1xf32>
    %34 = math.exp %33 : vector<8x1xf32>
    %cst_14 = arith.constant 1.000000e+00 : f32
    %35 = vector.broadcast %cst_14 : f32 to vector<8x1xf32>
    %36 = arith.subf %34, %35 : vector<8x1xf32>
    %cst_15 = arith.constant 0.00999999977 : f32
    %37 = vector.broadcast %cst_15 : f32 to vector<8x1xf32>
    %38 = arith.mulf %37, %36 : vector<8x1xf32>
    %39 = arith.addf %24, %38 : vector<8x1xf32>
    %cst_16 = arith.constant 2.000000e+00 : f32
    %40 = vector.broadcast %cst_16 : f32 to vector<8x16xf32>
    %41 = arith.mulf %40, %4 : vector<8x16xf32>
    %cst_17 = arith.constant dense<0xFF800000> : vector<8xf32>
    %42 = vector.multi_reduction <maximumf>, %41, %cst_17 [1] : vector<8x16xf32> to vector<8xf32>
    %43 = vector.shape_cast %42 : vector<8xf32> to vector<8x1xf32>
    %44 = vector.broadcast %43 : vector<8x1xf32> to vector<8x16xf32>
    %45 = arith.subf %41, %44 : vector<8x16xf32>
    %46 = math.exp %45 : vector<8x16xf32>
    %cst_18 = arith.constant dense<0.000000e+00> : vector<8xf32>
    %47 = vector.multi_reduction <add>, %46, %cst_18 [1] : vector<8x16xf32> to vector<8xf32>
    %48 = vector.shape_cast %47 : vector<8xf32> to vector<8x1xf32>
    %49 = math.log %48 : vector<8x1xf32>
    %50 = arith.addf %49, %43 : vector<8x1xf32>
    %51 = arith.mulf %5, %41 : vector<8x16xf32>
    %cst_19 = arith.constant dense<0.000000e+00> : vector<8xf32>
    %52 = vector.multi_reduction <add>, %51, %cst_19 [1] : vector<8x16xf32> to vector<8xf32>
    %53 = vector.shape_cast %52 : vector<8xf32> to vector<8x1xf32>
    %54 = arith.subf %50, %53 : vector<8x1xf32>
    %c0_20 = arith.constant 0 : index
    %c0_21 = arith.constant 0 : index
    %55 = memref.load %arg4[%c0_20, %c0_21] : memref<1x2xf32, #tpu.memory_space<smem>>
    %56 = vector.shape_cast %39 : vector<8x1xf32> to vector<1x8x1xf32>
    %cst_22 = arith.constant dense<0.000000e+00> : vector<1xf32>
    %57 = vector.multi_reduction <add>, %56, %cst_22 [1, 2] : vector<1x8x1xf32> to vector<1xf32>
    %58 = vector.shape_cast %57 : vector<1xf32> to vector<1x1x1xf32>
    %59 = vector.extract %58[0, 0, 0] : f32 from vector<1x1x1xf32>
    %60 = arith.addf %55, %59 : f32
    %c0_23 = arith.constant 0 : index
    %c0_24 = arith.constant 0 : index
    %61 = memref.load %arg4[%c0_23, %c0_24] : memref<1x2xf32, #tpu.memory_space<smem>>
    memref.store %60, %arg4[%c0_23, %c0_24] : memref<1x2xf32, #tpu.memory_space<smem>>
    %c0_25 = arith.constant 0 : index
    %c1 = arith.constant 1 : index
    %62 = memref.load %arg4[%c0_25, %c1] : memref<1x2xf32, #tpu.memory_space<smem>>
    %63 = vector.shape_cast %54 : vector<8x1xf32> to vector<1x8x1xf32>
    %cst_26 = arith.constant dense<0.000000e+00> : vector<1xf32>
    %64 = vector.multi_reduction <add>, %63, %cst_26 [1, 2] : vector<1x8x1xf32> to vector<1xf32>
    %65 = vector.shape_cast %64 : vector<1xf32> to vector<1x1x1xf32>
    %66 = vector.extract %65[0, 0, 0] : f32 from vector<1x1x1xf32>
    %67 = arith.addf %62, %66 : f32
    %c0_27 = arith.constant 0 : index
    %c1_28 = arith.constant 1 : index
    %68 = memref.load %arg4[%c0_27, %c1_28] : memref<1x2xf32, #tpu.memory_space<smem>>
    memref.store %67, %arg4[%c0_27, %c1_28] : memref<1x2xf32, #tpu.memory_space<smem>>
    %c0_i32_29 = arith.constant 0 : i32
    %69 = arith.cmpi eq, %arg0, %c0_i32_29 : i32
    %70 = arith.extui %69 : i1 to i32
    %c0_i32_30 = arith.constant 0 : i32
    %71 = arith.cmpi ne, %70, %c0_i32_30 : i32
    scf.if %71 {
      %c0_31 = arith.constant 0 : index
      %c0_32 = arith.constant 0 : index
      %72 = memref.load %arg4[%c0_31, %c0_32] : memref<1x2xf32, #tpu.memory_space<smem>>
      %cst_33 = arith.constant 8.000000e+00 : f32
      %73 = arith.divf %72, %cst_33 : f32
      %c0_34 = arith.constant 0 : index
      %c0_35 = arith.constant 0 : index
      %74 = memref.load %arg4[%c0_34, %c0_35] : memref<1x2xf32, #tpu.memory_space<smem>>
      memref.store %73, %arg4[%c0_34, %c0_35] : memref<1x2xf32, #tpu.memory_space<smem>>
      %c0_36 = arith.constant 0 : index
      %c1_37 = arith.constant 1 : index
      %75 = memref.load %arg4[%c0_36, %c1_37] : memref<1x2xf32, #tpu.memory_space<smem>>
      %cst_38 = arith.constant 8.000000e+00 : f32
      %76 = arith.divf %75, %cst_38 : f32
      %c0_39 = arith.constant 0 : index
      %c1_40 = arith.constant 1 : index
      %77 = memref.load %arg4[%c0_39, %c1_40] : memref<1x2xf32, #tpu.memory_space<smem>>
      memref.store %76, %arg4[%c0_39, %c1_40] : memref<1x2xf32, #tpu.memory_space<smem>>
    } else {
    }
    return
  }
  func.func @transform_0(%arg0: i32) -> (i32, i32) {
    %c0_i32 = arith.constant 0 : i32
    %c0_i32_0 = arith.constant 0 : i32
    return %arg0, %c0_i32 : i32, i32
  }
  func.func @transform_1(%arg0: i32) -> (i32, i32) {
    %c0_i32 = arith.constant 0 : i32
    %c0_i32_0 = arith.constant 0 : i32
    return %arg0, %c0_i32 : i32, i32
  }
  func.func @transform_2(%arg0: i32) -> (i32, i32) {
    %c0_i32 = arith.constant 0 : i32
    %c0_i32_0 = arith.constant 0 : i32
    return %arg0, %c0_i32 : i32, i32
  }
  func.func @transform_3(%arg0: i32) -> (i32, i32) {
    %c0_i32 = arith.constant 0 : i32
    %c0_i32_0 = arith.constant 0 : i32
    %c0_i32_1 = arith.constant 0 : i32
    return %c0_i32, %c0_i32_0 : i32, i32
  }
}

</mosaic_0001>

<bundles_post_ra>
// kernel: _fused_loss.1
= control target key start
LH: loop header
LB: loop body
LE: loop exit
PB: predicated region body
PF: predicated region fallthrough
CT: control target
= control target key end

     0   :  { %8 = vsyncpa [#allocation3], 0  ;;  %s351_s0 = inlined_call_operand.hbm [shape: f32[8,16], index: 0, kind: input, shape index: {}]   ;;  %s352_s1 = inlined_call_operand.hbm [shape: f32[8,16], index: 1, kind: input, shape index: {}]   ;;  %s353_s2 = inlined_call_operand.hbm [shape: f32[8,16], index: 2, kind: input, shape index: {}]   ;;  %s354_s3 = inlined_call_operand.vmem [shape: f32[1,2], index: 3, kind: output, shape index: {}]  }
   0x1   :  { %9 = vsyncpa [#allocation6], 0 }
   0x2   :  { %10 = vsyncpa [#allocation4], 0  ;;  %s278_s12 = smov [#allocation5]   ;;  %s279_s14 = smov [#allocation2]  }
   0x3   :  { %s27_s13 = sshll.u32 %s278_s12, 4  ;;  %s17_s15 = sshll.u32 %s279_s14, 4  ;;  %s28_s13 = int_to_ptr.vmem [resolvable:$true] %s27_s13  ;;  %s18_s15 = int_to_ptr.vmem [resolvable:$true] %s17_s15 }
   0x4   :  { %s194_s18 = scalar_lea.hbm %s352_s1, 128 }
   0x5   :  { %p195_p0 = scmp.ne.s32.totalorder %s352_s1, %s194_s18  ;;  %p198_p1 = scmp.lt.u32.totalorder %s194_s18, %s352_s1 }
   0x7   :  { %p200_p2 = pnand %p198_p1, %p195_p0 }
   0x9   :  { %203 = shalt.err (!%p200_p2)
}
   0xa   :  { %s204_s23 = scalar_lea.vmem %s28_s13, 128  ;;  %p209_p4 = scmp.lt.s32.totalorder %s28_s13, %s28_s13 }
   0xb   :  { %p205_p3 = scmp.ne.s32.totalorder %s28_s13, %s204_s23  ;;  %p210_p5 = scmp.lt.s32.totalorder %s204_s23, %s204_s23 }
   0xd   :  { %p211_p6 = por %p210_p5, %p209_p4 }
   0xf   :  { %p212_p7 = pnand %p211_p6, %p205_p3 }
  0x11   :  { %215 = shalt.err (!%p212_p7)
}
  0x12   :  { %30 = dma.hbm_to_vmem [thread:$0]  %s352_s1, 128, %s28_s13, [#allocation6]  }
  0x13   :  { %s216_s28 = scalar_lea.hbm %s351_s0, 128 }
  0x14   :  { %p217_p8 = scmp.ne.s32.totalorder %s351_s0, %s216_s28  ;;  %p220_p9 = scmp.lt.u32.totalorder %s216_s28, %s351_s0 }
  0x16   :  { %p222_p10 = pnand %p220_p9, %p217_p8 }
  0x18   :  { %225 = shalt.err (!%p222_p10)
}
  0x19   :  { %s226_s6 = scalar_lea.vmem %s18_s15, 128  ;;  %p231_p12 = scmp.lt.s32.totalorder %s18_s15, %s18_s15 }
  0x1a   :  { %p227_p11 = scmp.ne.s32.totalorder %s18_s15, %s226_s6  ;;  %p232_p13 = scmp.lt.s32.totalorder %s226_s6, %s226_s6 }
  0x1c   :  { %p233_p0 = por %p232_p13, %p231_p12 }
  0x1e   :  { %p234_p1 = pnand %p233_p0, %p227_p11 }
  0x20   :  { %237 = shalt.err (!%p234_p1)
}
  0x21   :  { %20 = dma.hbm_to_vmem [thread:$0]  %s351_s0, 128, %s18_s15, [#allocation3]  }
  0x22   :  { %s280_s8 = smov [#allocation7]   ;;  %s238_s12 = scalar_lea.hbm %s353_s2, 128 }
  0x23   :  { %s37_s9 = sshll.u32 %s280_s8, 4  ;;  %p239_p2 = scmp.ne.s32.totalorder %s353_s2, %s238_s12  ;;  %s38_s9 = int_to_ptr.vmem [resolvable:$true] %s37_s9 }
  0x24   :  { %p242_p3 = scmp.lt.u32.totalorder %s238_s12, %s353_s2 }
  0x26   :  { %p244_p4 = pnand %p242_p3, %p239_p2 }
  0x28   :  { %247 = shalt.err (!%p244_p4)
}
  0x29   :  { %s248_s18 = scalar_lea.vmem %s38_s9, 128  ;;  %p253_p6 = scmp.lt.s32.totalorder %s38_s9, %s38_s9 }
  0x2a   :  { %p249_p5 = scmp.ne.s32.totalorder %s38_s9, %s248_s18  ;;  %p254_p7 = scmp.lt.s32.totalorder %s248_s18, %s248_s18 }
  0x2c   :  { %p255_p8 = por %p254_p7, %p253_p6 }
  0x2e   :  { %p256_p9 = pnand %p255_p8, %p249_p5 }
  0x30   :  { %259 = shalt.err (!%p256_p9)
}
  0x31   :  { %40 = dma.hbm_to_vmem [thread:$0]  %s353_s2, 128, %s38_s9, [#allocation6]  }
  0x32   :  { %272 = dma.done.wait [#allocation3], 128  }
  0x33   :  { %273 = vsyncadd [#allocation3], 4294967168 }
  0x34   :  { %274 = dma.done.wait [#allocation6], 256  }
  0x35   :  { %275 = vsyncadd [#allocation6], 4294967040  ;;  %vm61_vm0 = vcmask 130048   ;;  %v58_v0 = vld [vmem:[#allocation2] sm:$0xff]  ;;  %v59_v1 = vld [vmem:[#allocation5] sm:$0xff]  ;;  %vm114_vm1 = vcmask 7168  }
  0x36   :  { %v62_v2 = vsel %vm61_vm0, %v58_v0, inf  ;;  %v95_v3 = vmul.f32 2.0, %v59_v1  ;;  %v60_v5 = vld [vmem:[#allocation7] sm:$0xff]  ;;  %s161_s21 = sshll.u32 %s354_s3, 4  ;;  %s162_s21 = int_to_ptr.vmem [resolvable:$true] %s161_s21 }
  0x37   :  { %63 = vmin.xlane.f32.xlu0 %v62_v2  ;;  %v83_v6 = vmul.f32 %v60_v5, %v58_v0  ;;  %s260_s25 = scalar_lea.vmem %s162_s21, 16  ;;  %p265_p11 = scmp.lt.s32.totalorder %s162_s21, %s162_s21 }
  0x38   :  { %v96_v4 = vsel %vm61_vm0, %v95_v3, -inf  ;;  %v108_v14 = vmul.f32 %v95_v3, %v60_v5  ;;  %p261_p10 = scmp.ne.s32.totalorder %s162_s21, %s260_s25  ;;  %p266_p12 = scmp.lt.s32.totalorder %s260_s25, %s260_s25 }
  0x39   :  { %97 = vmax.xlane.f32.xlu1 %v96_v4  ;;  %v84_v7 = vsel %vm61_vm0, %v83_v6, 0.0 }
  0x3a   :  { %v109_v17 = vsel %vm61_vm0, %v108_v14, 0.0  ;;  %p267_p13 = por %p266_p12, %p265_p11 }
  0x3c   :  { %p268_p0 = pnand %p267_p13, %p261_p10 }
  0x3d   :  { %85 = vadd.xlane.f32.xlu1 %v84_v7 }
  0xc4   :  { %v64_v8 = vpop.xlane.xlu0 %63 }
  0xc5   :  { %v65_v9 = vsub.f32 %v64_v8, %v58_v0 }
  0xc6   :  { %v98_v10 = vpop.xlane.xlu1 %97 }
  0xc7   :  { %v99_v11 = vsub.f32 %v95_v3, %v98_v10  ;;  %v66_v12 = vsel %vm61_vm0, %v65_v9, -inf  ;;  %v78_v25 = vmul.f32 %v65_v9, %v60_v5 }
  0xc8   :  { %67 = vmax.xlane.f32.xlu0 %v66_v12 }
  0xc9   :  { %v100_v13 = vmul.f32 1.442695, %v99_v11  ;;  %v79_v26 = vsel %vm61_vm0, %v78_v25, 0.0 }
  0xca   :  { %v86_v21 = vpop.xlane.xlu1 %85 }
  0xcb   :  { %184 = vpow2.f32 %v100_v13  ;;  %vm87_vm2 = vcmp.le.f32.partialorder %v86_v21, 1.0 }
  0xcc   :  { %v88_v33 = vsel %vm87_vm2, 0.0, %v86_v21 }
  0xcd   :  { %v89_v34 = vmul.f32 0.1, %v88_v33 }
  0xcf   :  { %v90_v35 = vmul.f32 1.442695, %v89_v34 }
  0xd5   :  { %v185_v15 = vpop.eup %184 }
  0xd6   :  { %v102_v16 = vsel %vm61_vm0, %v185_v15, 0.0 }
  0xd7   :  { %103 = vadd.xlane.f32.xlu1 %v102_v16 }
  0xdb   :  { %110 = vadd.xlane.f32.xlu1 %v109_v17 }
 0x155   :  { %v68_v18 = vpop.xlane.xlu0 %67 }
 0x156   :  { %v69_v19 = vsub.f32 %v65_v9, %v68_v18 }
 0x158   :  { %v70_v20 = vmul.f32 1.442695, %v69_v19 }
 0x15a   :  { %186 = vpow2.f32 %v70_v20 }
 0x164   :  { %v187_v22 = vpop.eup %186  ;;  %v104_v23 = vpop.xlane.xlu1 %103 }
 0x165   :  { %188 = vlog2.f32 %v104_v23  ;;  %v72_v24 = vsel %vm61_vm0, %v187_v22, 0.0 }
 0x166   :  { %73 = vadd.xlane.f32.xlu0 %v72_v24  ;;  %190 = vpow2.f32 %v90_v35 }
 0x168   :  { %v111_v29 = vpop.xlane.xlu1 %110 }
 0x16a   :  { %80 = vadd.xlane.f32.xlu0 %v79_v26 }
 0x16f   :  { %v189_v27 = vpop.eup %188 }
 0x170   :  { %v106_v28 = vmul.f32 0.6931472, %v189_v27  ;;  %v191_v37 = vpop.eup %190 }
 0x171   :  { %v172_v38 = vadd.f32 -1.0, %v191_v37 }
 0x172   :  { %v107_v30 = vadd.f32 %v106_v28, %v98_v10 }
 0x173   :  { %v93_v42 = vmul.f32 0.01, %v172_v38 }
 0x174   :  { %v112_v31 = vsub.f32 %v107_v30, %v111_v29 }
 0x176   :  { %v129_v32 = vsel %vm114_vm1, %v112_v31, 0.0 }
 0x177   :  { %130 = vadd.xlane.f32.xlu1 %v129_v32 }
 0x1f3   :  { %v74_v36 = vpop.xlane.xlu0 %73 }
 0x1f4   :  { %192 = vlog2.f32 %v74_v36 }
 0x1f7   :  { %v81_v43 = vpop.xlane.xlu0 %80 }
 0x1fe   :  { %v193_v39 = vpop.eup %192 }
 0x1ff   :  { %v76_v40 = vmul.f32 0.6931472, %v193_v39 }
 0x201   :  { %v77_v41 = vadd.f32 %v76_v40, %v68_v18 }
 0x203   :  { %v82_v44 = vsub.f32 %v77_v41, %v81_v43 }
 0x204   :  { %v131_v47 = vpop.xlane.xlu1 %130 }
 0x205   :  { %v94_v45 = vadd.f32 %v93_v42, %v82_v44  ;;  %v132_v48 = vrot.slane %v131_v47, 4 }
 0x207   :  { %v115_v46 = vsel %vm114_vm1, %v94_v45, 0.0  ;;  %v133_v49 = vadd.f32 %v132_v48, %v131_v47 }
 0x208   :  { %116 = vadd.xlane.f32.xlu0 %v115_v46 }
 0x209   :  { %v134_v50 = vrot.slane %v133_v49, 2 }
 0x20b   :  { %v135_v54 = vadd.f32 %v134_v50, %v133_v49 }
 0x20d   :  { %v136_v57 = vrot.slane %v135_v54, 1 }
 0x20f   :  { %v137_v60 = vadd.f32 %v136_v57, %v135_v54 }
 0x295   :  { %v117_v51 = vpop.xlane.xlu0 %116 }
 0x296   :  { %v118_v52 = vrot.slane %v117_v51, 4 }
 0x298   :  { %v119_v53 = vadd.f32 %v118_v52, %v117_v51 }
 0x29a   :  { %v120_v55 = vrot.slane %v119_v53, 2 }
 0x29c   :  { %v121_v56 = vadd.f32 %v120_v55, %v119_v53 }
 0x29e   :  { %v122_v58 = vrot.slane %v121_v56, 1 }
 0x2a0   :  { %v123_v59 = vadd.f32 %v122_v58, %v121_v56 }
 0x2a2   :  { %175 = vpush %v123_v59 }
 0x2a3   :  { %177 = vpush %v137_v60 }
 0x2d3   :  { %s176_s2 = spop %175 }
 0x2d4   :  { %s178_s22 = spop %177  ;;  %s148_s23 = smul.f32 0.125, %s176_s2 }
 0x2d5   :  { %s153_s24 = smul.f32 0.125, %s178_s22 }
 0x2d6   :  { %149 = sst [smem:[#allocation8]] %s148_s23 }
 0x2d7   :  { %154 = sst [smem:[#allocation8 + $0x1]] %s153_s24 }
 0x2d8   :  { %271 = shalt.err (!%p268_p0)
}
 0x2d9   :  { %s281_s26 = smov [#allocation8]  }
 0x2da   :  { %164 = dma.smem_to_vmem %s281_s26, 16, %s162_s21, [#allocation4]  }
 0x2db   :  { %276 = dma.done.wait [#allocation4], 16  }
 0x2dc   :  { %277 = vsyncadd [#allocation4], 4294967280 }
 0x2dd   :  { %168 = sfence }
 0x2de   :  { %169 = vsyncpa [#allocation3], 1 }
 0x2df   :  { %170 = vsyncpa [#allocation6], 1 }
 0x2e0   :  { %171 = vsyncpa [#allocation4], 1 }

</bundles_post_ra>
